<compile_context>
chip_gen: v5e
topology: v5e:2x2
jax: 0.10.0
libtpu: 0.0.40
codegen_flags: <defaults>
</compile_context>

<pallas_src>
import functools

import jax
import jax.numpy as jnp
import numpy as np
from jax.experimental import pallas as pl
from jax.experimental.pallas import tpu as pltpu

BN_EPS = 1e-5


# --------------------------------------------------------------------------- #
# Kernel
# --------------------------------------------------------------------------- #
def _fused_double_conv_kernel(x_ref, m1_ref, s1_ref, m2_ref, s2_ref, o_ref, *,
                              total_rows):
    """Fused (conv3x3 + BN + ReLU) x 2 on one row tile.

    x_ref : (tile+4, W*Cin)   input rows with 2-row zero halo, channels in lanes
    m1_ref: (3, W*Cin, W*Cm)  banded stage-1 weights (BN scale folded), one per dy
    s1_ref: (1, W*Cm)         folded stage-1 shift (conv bias + BN)
    m2_ref: (3, W*Cm, W*Cout) banded stage-2 weights
    s2_ref: (1, W*Cout)       folded stage-2 shift
    o_ref : (tile, W*Cout)    lane-dense output rows
    """
    tile, _ = o_ref.shape
    wcm = m1_ref.shape[-1]
    wcout = m2_ref.shape[-1]

    # -- stage 1: activation rows [t*tile - 1, t*tile + tile + 1) ------------------
    acc1 = jnp.zeros((tile + 2, wcm), jnp.float32)
    for dy in range(3):                               # 3 sublane row shifts
        acc1 = acc1 + jnp.dot(x_ref[dy:dy + tile + 2, :], m1_ref[dy],
                              preferred_element_type=jnp.float32)
    h1 = jnp.maximum(acc1 + s1_ref[...], 0.0)

    # Zero halo rows that fall outside the image: the second conv's pad=1 requires
    # exact zeros there (ReLU(shift) != 0 in general).
    g = (pl.program_id(1) * tile - 1
         + jax.lax.broadcasted_iota(jnp.int32, (tile + 2, 1), 0))
    h1 = jnp.where(jnp.logical_and(g >= 0, g < total_rows), h1, 0.0)

    # -- stage 2: output rows [t*tile, t*tile + tile) -------------------------------
    acc2 = jnp.zeros((tile, wcout), jnp.float32)
    for dy in range(3):
        acc2 = acc2 + jnp.dot(h1[dy:dy + tile, :], m2_ref[dy],
                              preferred_element_type=jnp.float32)
    o_ref[...] = jnp.maximum(acc2 + s2_ref[...], 0.0)


# --------------------------------------------------------------------------- #
# Wrapper glue (parameter folding, lane packing, tiling)
# --------------------------------------------------------------------------- #
def _band_matrices(w_hwio, width):
    """(3,3,Cin,Cout) conv weights -> (3, W*Cin, W*Cout) banded lane matrices.

    With channels packed into lanes as lane = w*C + c, the pad=1 conv over W
    becomes, per row offset dy, a matmul against a banded matrix whose (wi, wo)
    block is w[dy, wi-wo+1] when |wi-wo| <= 1 and zero otherwise (missing boundary
    taps implement the zero padding)."""
    kh, kw, cin, cout = w_hwio.shape
    wi = jnp.arange(width)[:, None]
    wo = jnp.arange(width)[None, :]
    dx = wi - wo + 1                                    # (W, W)
    sel = jnp.logical_and(dx >= 0, dx < kw)
    dx_c = jnp.clip(dx, 0, kw - 1)
    mats = []
    for dy in range(kh):
        blocks = w_hwio[dy][dx_c]                       # (W, W, Cin, Cout)
        blocks = jnp.where(sel[:, :, None, None], blocks, 0.0)
        mats.append(blocks.transpose(0, 2, 1, 3).reshape(width * cin, width * cout))
    return jnp.stack(mats, axis=0)


def _fold_stage(stage_params, width):
    """Fold conv bias + BatchNorm (eval mode) into banded weights and a shift row."""
    w_hwio, bias, gamma, beta, run_mean, run_var = stage_params
    scale = gamma / jnp.sqrt(run_var + BN_EPS)          # (Cout,)
    w_folded = (w_hwio * scale).astype(jnp.float32)     # BN scale into weights
    shift = (bias - run_mean) * scale + beta            # (Cout,)
    cout = w_hwio.shape[-1]
    m = _band_matrices(w_folded, width)
    s_row = jnp.tile(shift, width).reshape(1, width * cout).astype(jnp.float32)
    return m, s_row, cout


def _pick_row_tile(height, lane_in, lane_mid, lane_out, vmem_budget_bytes=8 << 20):
    """Largest divisor of H whose 2x-buffered input/output blocks stay inside a
    conservative VMEM budget (well under v7x's 32 MiB scoped default)."""
    bytes_per_row = 4 * (2 * (lane_in + lane_out) + lane_mid)
    cap = max(8, vmem_budget_bytes // max(bytes_per_row, 1))
    cap = min(cap, 512)
    best = 1
    for d in range(1, height + 1):
        if height % d == 0 and d <= cap:
            best = d
    return best


def double_convolver(x_nchw, params, row_tile=None):
    """Pallas implementation of DoubleConvolver.forward (NCHW in / NCHW out)."""
    x = jnp.transpose(x_nchw, (0, 2, 3, 1)).astype(jnp.float32)     # NCHW -> NHWC
    n, height, width, cin = x.shape

    m1, s1, cmid = _fold_stage(params["stage1"], width)
    m2, s2, cout = _fold_stage(params["stage2"], width)

    if row_tile is None:
        row_tile = _pick_row_tile(height, width * cin, width * cmid, width * cout)
    assert height % row_tile == 0, "row_tile must divide H"
    n_tiles = height // row_tile

    # Pack channels into lanes and pre-split overlapping row slabs (2-row zero halo).
    x_lanes = x.reshape(n, height, width * cin)
    x_pad = jnp.pad(x_lanes, ((0, 0), (2, 2), (0, 0)))
    row_idx = ((jnp.arange(n_tiles) * row_tile)[:, None]
               + jnp.arange(row_tile + 4)[None, :])
    slabs = x_pad[:, row_idx, :]                        # (N, n_tiles, tile+4, W*Cin)

    kernel = functools.partial(_fused_double_conv_kernel, total_rows=height)

    out = pl.pallas_call(
        kernel,
        out_shape=jax.ShapeDtypeStruct((n, n_tiles, row_tile, width * cout),
                                       jnp.float32),
        grid=(n, n_tiles),
        in_specs=[
            pl.BlockSpec((None, None, row_tile + 4, width * cin),
                         lambda i, t: (i, t, 0, 0)),
            pl.BlockSpec((3, width * cin, width * cmid), lambda i, t: (0, 0, 0)),
            pl.BlockSpec((1, width * cmid), lambda i, t: (0, 0)),
            pl.BlockSpec((3, width * cmid, width * cout), lambda i, t: (0, 0, 0)),
            pl.BlockSpec((1, width * cout), lambda i, t: (0, 0)),
        ],
        out_specs=pl.BlockSpec((None, None, row_tile, width * cout),
                               lambda i, t: (i, t, 0, 0)),
        compiler_params=pltpu.CompilerParams(
            dimension_semantics=("parallel", "parallel")),
    )(slabs, m1, s1, m2, s2)

    out = out.reshape(n, height, width, cout)           # unpack lanes
    return jnp.transpose(out, (0, 3, 1, 2))             # NHWC -> NCHW


# ----------------------------- reference ------------------------------------
def reference_double_convolver(x_nchw, params):
    x = jnp.transpose(x_nchw, (0, 2, 3, 1)).astype(jnp.float32)

    def stage(h, w_hwio, bias, gamma, beta, run_mean, run_var):
        y = jax.lax.conv_general_dilated(
            h, w_hwio, window_strides=(1, 1), padding="SAME",
            dimension_numbers=("NHWC", "HWIO", "NHWC"),
            precision=jax.lax.Precision.HIGHEST) + bias
        y = (y - run_mean) / jnp.sqrt(run_var + BN_EPS) * gamma + beta
        return jnp.maximum(y, 0.0)

    h = stage(x, *params["stage1"])
    h = stage(h, *params["stage2"])
    return jnp.transpose(h, (0, 3, 1, 2))


# ------------------------------- main ---------------------------------------
def make_stage_params(key, cin, cout):
    ks = jax.random.split(key, 6)
    w = 0.2 * jax.random.normal(ks[0], (3, 3, cin, cout), jnp.float32)   # HWIO
    b = 0.1 * jax.random.normal(ks[1], (cout,), jnp.float32)
    gamma = 1.0 + 0.1 * jax.random.normal(ks[2], (cout,), jnp.float32)
    beta = 0.1 * jax.random.normal(ks[3], (cout,), jnp.float32)
    # TODO(synk): PyTorch BatchNorm2d in train mode uses batch statistics;
    # here BN is applied in inference mode with fixed running stats.
    run_mean = 0.1 * jax.random.normal(ks[4], (cout,), jnp.float32)
    run_var = 0.5 + jnp.abs(jax.random.normal(ks[5], (cout,), jnp.float32))
    return (w, b, gamma, beta, run_mean, run_var)


if __name__ == "__main__":
    key = jax.random.PRNGKey(0)
    k_x, k_s1, k_s2 = jax.random.split(key, 3)

    in_channels, out_channels = 4, 8
    x = jax.random.normal(k_x, (2, in_channels, 16, 16), jnp.float32)    # NCHW

    params = {
        "stage1": make_stage_params(k_s1, in_channels, out_channels),
        "stage2": make_stage_params(k_s2, out_channels, out_channels),
    }

    # row_tile=8 -> grid (2, 2): exercises multi-tile halo masking + pipelining.
    out = double_convolver(x, params, row_tile=8)
    out = jax.block_until_ready(out)

    ref = reference_double_convolver(x, params)
    np.testing.assert_allclose(np.asarray(out), np.asarray(ref),
                               rtol=1e-3, atol=1e-3)
    assert out.shape == (2, out_channels, 16, 16)
    print("KERNEL_OK")
</pallas_src>

<mosaic_0001>
module attributes {stable_mosaic.version = 11 : i64} {
  func.func @_fused_double_conv_kernel(%arg0: i32, %arg1: i32, %arg2: memref<1x1x12x64xf32, #tpu.memory_space<vmem>>, %arg3: memref<3x64x128xf32, #tpu.memory_space<vmem>>, %arg4: memref<1x128xf32, #tpu.memory_space<vmem>>, %arg5: memref<3x128x128xf32, #tpu.memory_space<vmem>>, %arg6: memref<1x128xf32, #tpu.memory_space<vmem>>, %arg7: memref<1x1x8x128xf32, #tpu.memory_space<vmem>>) attributes {dimension_semantics = [#tpu.dimension_semantics<parallel>, #tpu.dimension_semantics<parallel>], iteration_bounds = array<i64: 2, 2>, scalar_prefetch = 0 : i64, scratch_operands = 0 : i64, tpu.core_type = #tpu.core_type<tc>, window_params = [{transform_indices = @transform_0, window_bounds = array<i64: 1, 1, 12, 64>}, {pipeline_mode = #tpu.pipeline_mode<synchronous>, transform_indices = @transform_1, window_bounds = array<i64: 3, 64, 128>}, {pipeline_mode = #tpu.pipeline_mode<synchronous>, transform_indices = @transform_2, window_bounds = array<i64: 1, 128>}, {pipeline_mode = #tpu.pipeline_mode<synchronous>, transform_indices = @transform_3, window_bounds = array<i64: 3, 128, 128>}, {pipeline_mode = #tpu.pipeline_mode<synchronous>, transform_indices = @transform_4, window_bounds = array<i64: 1, 128>}, {transform_indices = @transform_5, window_bounds = array<i64: 1, 1, 8, 128>}]} {
    %cst = arith.constant 0.000000e+00 : f32
    %0 = vector.broadcast %cst : f32 to vector<10x128xf32>
    %c0 = arith.constant 0 : index
    %c0_0 = arith.constant 0 : index
    %c0_1 = arith.constant 0 : index
    %c0_2 = arith.constant 0 : index
    %1 = vector.load %arg2[%c0, %c0_0, %c0_1, %c0_2] : memref<1x1x12x64xf32, #tpu.memory_space<vmem>>, vector<1x1x10x64xf32>
    %2 = vector.shape_cast %1 : vector<1x1x10x64xf32> to vector<10x64xf32>
    %c0_3 = arith.constant 0 : index
    %c0_4 = arith.constant 0 : index
    %c0_5 = arith.constant 0 : index
    %3 = vector.load %arg3[%c0_3, %c0_4, %c0_5] : memref<3x64x128xf32, #tpu.memory_space<vmem>>, vector<1x64x128xf32>
    %4 = vector.shape_cast %3 : vector<1x64x128xf32> to vector<64x128xf32>
    %cst_6 = arith.constant dense<0.000000e+00> : vector<10x128xf32>
    %5 = tpu.matmul %2, %4, %cst_6 {dimension_numbers = #tpu.dot_dimension_numbers<[1], [0], [0], [1], [0, 0, 1, 1], [], []>} : vector<10x64xf32>, vector<64x128xf32>, vector<10x128xf32> -> vector<10x128xf32>
    %6 = arith.addf %0, %5 : vector<10x128xf32>
    %c0_7 = arith.constant 0 : index
    %c0_8 = arith.constant 0 : index
    %c1 = arith.constant 1 : index
    %c0_9 = arith.constant 0 : index
    %7 = vector.load %arg2[%c0_7, %c0_8, %c1, %c0_9] : memref<1x1x12x64xf32, #tpu.memory_space<vmem>>, vector<1x1x10x64xf32>
    %8 = vector.shape_cast %7 : vector<1x1x10x64xf32> to vector<10x64xf32>
    %c1_10 = arith.constant 1 : index
    %c0_11 = arith.constant 0 : index
    %c0_12 = arith.constant 0 : index
    %9 = vector.load %arg3[%c1_10, %c0_11, %c0_12] : memref<3x64x128xf32, #tpu.memory_space<vmem>>, vector<1x64x128xf32>
    %10 = vector.shape_cast %9 : vector<1x64x128xf32> to vector<64x128xf32>
    %cst_13 = arith.constant dense<0.000000e+00> : vector<10x128xf32>
    %11 = tpu.matmul %8, %10, %cst_13 {dimension_numbers = #tpu.dot_dimension_numbers<[1], [0], [0], [1], [0, 0, 1, 1], [], []>} : vector<10x64xf32>, vector<64x128xf32>, vector<10x128xf32> -> vector<10x128xf32>
    %12 = arith.addf %6, %11 : vector<10x128xf32>
    %c0_14 = arith.constant 0 : index
    %c0_15 = arith.constant 0 : index
    %c2 = arith.constant 2 : index
    %c0_16 = arith.constant 0 : index
    %13 = vector.load %arg2[%c0_14, %c0_15, %c2, %c0_16] : memref<1x1x12x64xf32, #tpu.memory_space<vmem>>, vector<1x1x10x64xf32>
    %14 = vector.shape_cast %13 : vector<1x1x10x64xf32> to vector<10x64xf32>
    %c2_17 = arith.constant 2 : index
    %c0_18 = arith.constant 0 : index
    %c0_19 = arith.constant 0 : index
    %15 = vector.load %arg3[%c2_17, %c0_18, %c0_19] : memref<3x64x128xf32, #tpu.memory_space<vmem>>, vector<1x64x128xf32>
    %16 = vector.shape_cast %15 : vector<1x64x128xf32> to vector<64x128xf32>
    %cst_20 = arith.constant dense<0.000000e+00> : vector<10x128xf32>
    %17 = tpu.matmul %14, %16, %cst_20 {dimension_numbers = #tpu.dot_dimension_numbers<[1], [0], [0], [1], [0, 0, 1, 1], [], []>} : vector<10x64xf32>, vector<64x128xf32>, vector<10x128xf32> -> vector<10x128xf32>
    %18 = arith.addf %12, %17 : vector<10x128xf32>
    %c0_21 = arith.constant 0 : index
    %c0_22 = arith.constant 0 : index
    %19 = vector.load %arg4[%c0_21, %c0_22] : memref<1x128xf32, #tpu.memory_space<vmem>>, vector<1x128xf32>
    %20 = vector.broadcast %19 : vector<1x128xf32> to vector<10x128xf32>
    %21 = arith.addf %18, %20 : vector<10x128xf32>
    %cst_23 = arith.constant 0.000000e+00 : f32
    %22 = vector.broadcast %cst_23 : f32 to vector<10x128xf32>
    %23 = arith.maximumf %21, %22 : vector<10x128xf32>
    %c8_i32 = arith.constant 8 : i32
    %24 = arith.muli %arg1, %c8_i32 : i32
    %c1_i32 = arith.constant 1 : i32
    %25 = arith.subi %24, %c1_i32 : i32
    %26 = tpu.iota {dimensions = array<i32: 0>} : vector<10x1xi32>
    %27 = vector.broadcast %25 : i32 to vector<10x1xi32>
    %28 = arith.addi %27, %26 : vector<10x1xi32>
    %c0_i32 = arith.constant 0 : i32
    %29 = vector.broadcast %c0_i32 : i32 to vector<10x1xi32>
    %30 = arith.cmpi sge, %28, %29 : vector<10x1xi32>
    %c16_i32 = arith.constant 16 : i32
    %31 = vector.broadcast %c16_i32 : i32 to vector<10x1xi32>
    %32 = arith.cmpi slt, %28, %31 : vector<10x1xi32>
    %33 = arith.andi %30, %32 : vector<10x1xi1>
    %cst_24 = arith.constant 0.000000e+00 : f32
    %34 = vector.shape_cast %33 : vector<10x1xi1> to vector<10x1xi1>
    %35 = vector.broadcast %34 : vector<10x1xi1> to vector<10x128xi1>
    %36 = vector.broadcast %cst_24 : f32 to vector<10x128xf32>
    %37 = arith.select %35, %23, %36 : vector<10x128xi1>, vector<10x128xf32>
    %cst_25 = arith.constant 0.000000e+00 : f32
    %38 = vector.broadcast %cst_25 : f32 to vector<8x128xf32>
    %39 = vector.extract_strided_slice %37 {offsets = [0, 0], sizes = [8, 128], strides = [1, 1]} : vector<10x128xf32> to vector<8x128xf32>
    %c0_26 = arith.constant 0 : index
    %c0_27 = arith.constant 0 : index
    %c0_28 = arith.constant 0 : index
    %40 = vector.load %arg5[%c0_26, %c0_27, %c0_28] : memref<3x128x128xf32, #tpu.memory_space<vmem>>, vector<1x128x128xf32>
    %41 = vector.shape_cast %40 : vector<1x128x128xf32> to vector<128x128xf32>
    %cst_29 = arith.constant dense<0.000000e+00> : vector<8x128xf32>
    %42 = tpu.matmul %39, %41, %cst_29 {dimension_numbers = #tpu.dot_dimension_numbers<[1], [0], [0], [1], [0, 0, 1, 1], [], []>} : vector<8x128xf32>, vector<128x128xf32>, vector<8x128xf32> -> vector<8x128xf32>
    %43 = arith.addf %38, %42 : vector<8x128xf32>
    %44 = vector.extract_strided_slice %37 {offsets = [1, 0], sizes = [8, 128], strides = [1, 1]} : vector<10x128xf32> to vector<8x128xf32>
    %c1_30 = arith.constant 1 : index
    %c0_31 = arith.constant 0 : index
    %c0_32 = arith.constant 0 : index
    %45 = vector.load %arg5[%c1_30, %c0_31, %c0_32] : memref<3x128x128xf32, #tpu.memory_space<vmem>>, vector<1x128x128xf32>
    %46 = vector.shape_cast %45 : vector<1x128x128xf32> to vector<128x128xf32>
    %cst_33 = arith.constant dense<0.000000e+00> : vector<8x128xf32>
    %47 = tpu.matmul %44, %46, %cst_33 {dimension_numbers = #tpu.dot_dimension_numbers<[1], [0], [0], [1], [0, 0, 1, 1], [], []>} : vector<8x128xf32>, vector<128x128xf32>, vector<8x128xf32> -> vector<8x128xf32>
    %48 = arith.addf %43, %47 : vector<8x128xf32>
    %49 = vector.extract_strided_slice %37 {offsets = [2, 0], sizes = [8, 128], strides = [1, 1]} : vector<10x128xf32> to vector<8x128xf32>
    %c2_34 = arith.constant 2 : index
    %c0_35 = arith.constant 0 : index
    %c0_36 = arith.constant 0 : index
    %50 = vector.load %arg5[%c2_34, %c0_35, %c0_36] : memref<3x128x128xf32, #tpu.memory_space<vmem>>, vector<1x128x128xf32>
    %51 = vector.shape_cast %50 : vector<1x128x128xf32> to vector<128x128xf32>
    %cst_37 = arith.constant dense<0.000000e+00> : vector<8x128xf32>
    %52 = tpu.matmul %49, %51, %cst_37 {dimension_numbers = #tpu.dot_dimension_numbers<[1], [0], [0], [1], [0, 0, 1, 1], [], []>} : vector<8x128xf32>, vector<128x128xf32>, vector<8x128xf32> -> vector<8x128xf32>
    %53 = arith.addf %48, %52 : vector<8x128xf32>
    %c0_38 = arith.constant 0 : index
    %c0_39 = arith.constant 0 : index
    %54 = vector.load %arg6[%c0_38, %c0_39] : memref<1x128xf32, #tpu.memory_space<vmem>>, vector<1x128xf32>
    %55 = vector.broadcast %54 : vector<1x128xf32> to vector<8x128xf32>
    %56 = arith.addf %53, %55 : vector<8x128xf32>
    %cst_40 = arith.constant 0.000000e+00 : f32
    %57 = vector.broadcast %cst_40 : f32 to vector<8x128xf32>
    %58 = arith.maximumf %56, %57 : vector<8x128xf32>
    %c0_41 = arith.constant 0 : index
    %c0_42 = arith.constant 0 : index
    %c0_43 = arith.constant 0 : index
    %c0_44 = arith.constant 0 : index
    %59 = vector.load %arg7[%c0_41, %c0_42, %c0_43, %c0_44] : memref<1x1x8x128xf32, #tpu.memory_space<vmem>>, vector<1x1x8x128xf32>
    %60 = vector.shape_cast %59 : vector<1x1x8x128xf32> to vector<8x128xf32>
    %61 = vector.shape_cast %58 : vector<8x128xf32> to vector<1x1x8x128xf32>
    tpu.vector_store %arg7[%c0_41, %c0_42, %c0_43, %c0_44], %61 {strides = array<i32>} : memref<1x1x8x128xf32, #tpu.memory_space<vmem>>, vector<1x1x8x128xf32>,
    return
  }
  func.func @transform_0(%arg0: i32, %arg1: i32) -> (i32, i32, i32, i32) {
    %c0_i32 = arith.constant 0 : i32
    %c0_i32_0 = arith.constant 0 : i32
    %c0_i32_1 = arith.constant 0 : i32
    return %arg0, %arg1, %c0_i32, %c0_i32_0 : i32, i32, i32, i32
  }
  func.func @transform_1(%arg0: i32, %arg1: i32) -> (i32, i32, i32) {
    %c0_i32 = arith.constant 0 : i32
    %c0_i32_0 = arith.constant 0 : i32
    %c0_i32_1 = arith.constant 0 : i32
    %c0_i32_2 = arith.constant 0 : i32
    return %c0_i32, %c0_i32_0, %c0_i32_1 : i32, i32, i32
  }
  func.func @transform_2(%arg0: i32, %arg1: i32) -> (i32, i32) {
    %c0_i32 = arith.constant 0 : i32
    %c0_i32_0 = arith.constant 0 : i32
    %c0_i32_1 = arith.constant 0 : i32
    return %c0_i32, %c0_i32_0 : i32, i32
  }
  func.func @transform_3(%arg0: i32, %arg1: i32) -> (i32, i32, i32) {
    %c0_i32 = arith.constant 0 : i32
    %c0_i32_0 = arith.constant 0 : i32
    %c0_i32_1 = arith.constant 0 : i32
    %c0_i32_2 = arith.constant 0 : i32
    return %c0_i32, %c0_i32_0, %c0_i32_1 : i32, i32, i32
  }
  func.func @transform_4(%arg0: i32, %arg1: i32) -> (i32, i32) {
    %c0_i32 = arith.constant 0 : i32
    %c0_i32_0 = arith.constant 0 : i32
    %c0_i32_1 = arith.constant 0 : i32
    return %c0_i32, %c0_i32_0 : i32, i32
  }
  func.func @transform_5(%arg0: i32, %arg1: i32) -> (i32, i32, i32, i32) {
    %c0_i32 = arith.constant 0 : i32
    %c0_i32_0 = arith.constant 0 : i32
    %c0_i32_1 = arith.constant 0 : i32
    return %arg0, %arg1, %c0_i32, %c0_i32_0 : i32, i32, i32, i32
  }
}

</mosaic_0001>

<bundles_post_ra>
// kernel: tpu_custom_call.1
= control target key start
LH: loop header
LB: loop body
LE: loop exit
PB: predicated region body
PF: predicated region fallthrough
CT: control target
= control target key end

     0   :  { %10 = vsyncpa [#allocation3], 0  ;;  %s1178_s0 = inlined_call_operand.vmem [shape: f32[2,2,12,64], index: 0, kind: input, shape index: {}]   ;;  %s1179_s1 = inlined_call_operand.hbm [shape: f32[3,64,128], index: 1, kind: input, shape index: {}]   ;;  %s1180_s2 = inlined_call_operand.vmem [shape: f32[1,128], index: 2, kind: input, shape index: {}]   ;;  %s1181_s3 = inlined_call_operand.hbm [shape: f32[3,128,128], index: 3, kind: input, shape index: {}]   ;;  %s1182_s4 = inlined_call_operand.vmem [shape: f32[1,128], index: 4, kind: input, shape index: {}]   ;;  %s1183_s5 = inlined_call_operand.hbm [shape: f32[2,2,8,128], index: 5, kind: output, shape index: {}]  }
   0x1   :  { %11 = vsyncpa [#allocation6], 0 }
   0x2   :  { %12 = vsyncpa [#allocation4], 0 }
   0x3   :  { %14 = vsyncpa [#allocation4 + $0x1], 0  ;;  %s1007_s18 = smov 0   ;;  %s1009_s19 = smov 0  }
   0x4   :  { %s1011_s20 = smov 0   ;;  %s1013_s21 = smov 0  }
   0x5   :  { %s1015_s22 = smov 0   ;;  %s1017_s23 = smov 0  }
   0x6   :  { %s1019_s24 = smov 0   ;;  %s1021_s25 = smov 0  }
   0x7 LB: > { %1187 = sst [smem:[#allocation11_spill]] %s967_s24  ;;  %s686_s26 = sadd.s32 4294967295, %s971_s25   ;;  %s971_s25 = sphi %s1021_s25, %s20_s25   ;;  %s967_s24 = sphi %s1019_s24, %s1196_s24   ;;  %s963_s23 = sphi %s1017_s23, %s1201_s23   ;;  %s959_s22 = sphi %s1015_s22, %s1194_s22   ;;  %s955_s21 = sphi %s1013_s21, %s1200_s21   ;;  %s951_s20 = sphi %s1011_s20, %s1199_s20   ;;  %s947_s19 = sphi %s1009_s19, %s1198_s19   ;;  %s943_s18 = sphi %s1007_s18, %s1197_s18  }
   0x8   : > { %s687_s27 = sadd.s32 4294967294, %s971_s25   ;;  %s29_s28 = sadd.s32 1, %s963_s23 }
   0x9   : > { %s32_s29 = sadd.s32 1, %s967_s24  ;;  %p30_p0 = scmp.ge.s32.totalorder %s29_s28, 2 }
   0xa   : > { %s153_s30 = sadd.s32 1, %s951_s20  ;;  %p163_p1 = scmp.ne.s32.totalorder %s951_s20, %s947_s19 }
   0xb   : > { %p164_p2 = scmp.eq.s32.totalorder %s686_s26, 3  ;;  %s1203_s28 = smov (%p30_p0, %s29_s28), 0 }
   0xc   : > { %1188 = sst [smem:[#allocation12_spill]] %s1203_s28  ;;  %s1205_s29 = smov (!%p30_p0, %s32_s29), %s967_s24 }
   0xd   : > { %s149_s6 = ssub.s32 %s963_s23, %s1203_s28  ;;  %p1059_p3 = por %p164_p2, %p163_p1 }
   0xe   : > { %p34_p4 = scmp.ge.s32.totalorder %s1205_s29, 2  ;;  %p169_p5 = scmp.ne.s32.totalorder %s947_s19, %s943_s18 }
   0xf   : > { %p170_p6 = scmp.eq.s32.totalorder %s687_s27, 3  ;;  %p688_p7 = scmp.ge.s32.totalorder %s971_s25, 1 }
  0x10   : > { %s1207_s29 = smov (%p34_p4, %s1205_s29), 0  ;;  %p177_p9 = scmp.lt.s32.totalorder %s971_s25, 5 }
  0x11   : > { %1190 = sst [smem:[#allocation13_spill]] %s1207_s29  ;;  %p1068_p8 = por %p170_p6, %p169_p5 }
  0x12   : > { %s148_s9 = ssub.s32 %s967_s24, %s1207_s29  ;;  %p1075_p10 = pnand %p688_p7, %p177_p9 }
  0x13   : > { %s150_s10 = sor.u32 %s149_s6, %s148_s9  ;;  %p1079_p12 = scmp.eq.s32.totalorder %s686_s26, 0 }
  0x14   : > { %p151_p11 = scmp.eq.s32.totalorder %s150_s10, 0  ;;  %p723_p13 = pneg %p1075_p10 }
  0x15   : > { %s188_s15 = sshll.u32 %s1179_s1, 4  ;;  %s973_s17 = smov [#allocation2]   ;;  %s189_s15 = int_to_ptr.hbm [resolvable:$true] %s188_s15 }
  0x16   : > { %s1089_s16 = scalar_select %p151_p11, %s951_s20, %s153_s30  }
  0x17   : > { %s190_s27 = sshll.u32 %s973_s17, 4  ;;  %p724_p0 = pnand %p1079_p12, %p723_p13  ;;  %s191_s27 = int_to_ptr.vmem [resolvable:$true] %s190_s27 }
  0x18   : > { %s974_s6 = smov 128   ;;  %s975_s26 = smov 8  }
  0x19   : > { %726 = dma.hbm_to_vmem [thread:$0]  (!%p724_p0), %s189_s15, 3072, %s191_s27, [#allocation3], %s974_s6, %s974_s6, %s975_s26  }
  0x1a   : > { %s205_s29 = sshll.u32 %s1181_s3, 4  ;;  %s976_s28 = smov [#allocation5]   ;;  %s206_s29 = int_to_ptr.hbm [resolvable:$true] %s205_s29 }
  0x1b   : > { %s207_s24 = sshll.u32 %s976_s28, 4  ;;  %238 = sbr.rel (%p1075_p10) target bundleno = 360 (0x168), region = 40  ;;  %s208_s24 = int_to_ptr.vmem [resolvable:$true] %s207_s24 }
  0x1c   : > { %729 = dma.hbm_to_vmem [thread:$0]  (!%p724_p0), %s206_s29, 6144, %s208_s24, [#allocation6], %s974_s6, %s974_s6, %s975_s26  }
  0x20   : > { %930 = dma.done.wait (%p1079_p12), [#allocation3], 3072  }
  0x21   : > { %932 = vsyncadd (%p1079_p12), [#allocation3], 4294964224 }
  0x22   : > { %934 = dma.done.wait (%p1079_p12), [#allocation6], 6144  }
  0x23   : > { %936 = vsyncadd (%p1079_p12), [#allocation6], 4294961152  ;;  %p276_p1 = scmp.lt.s32.totalorder %s959_s22, 1  ;;  %p278_p2 = scmp.lt.s32.totalorder %s955_s21, 1  ;;  %v305_v0 = vld [vmem:[#allocation2 + $0x78] sm:$0xff]  ;;  %v304_v1 = vld [vmem:[#allocation2 + $0x70] sm:$0xff] }
  0x24   : > { %321 = vmatpush.msra.mxu2 %v305_v0  ;;  %v294_v2 = vld [vmem:[#allocation2 + $0x38] sm:$0xff]  ;;  %v303_v3 = vld [vmem:[#allocation2 + $0x68] sm:$0xff]  ;;  %v293_v4 = vld [vmem:[#allocation2 + $0x30] sm:$0xff]  ;;  %vm306_vm0 = vcmask 523264   ;;  %s705_s17 = sshll.u32 %s955_s21, 3  ;;  %vm470_vm7 = vcmask 1046528  }
  0x25   : > { %s277_s24 = scalar_select %p276_p1, %s959_s22, 1  ;;  %350 = vmatpush.msra.mxu1 %v294_v2  ;;  %v292_v5 = vld [vmem:[#allocation2 + $0x28] sm:$0xff]  ;;  %v302_v6 = vld [vmem:[#allocation2 + $0x60] sm:$0xff]  ;;  %v301_v8 = vld [vmem:[#allocation2 + $0x58] sm:$0xff]  ;;  %vm532_vm8 = vcmask 1045504  }
  0x26   : > { %s279_s28 = scalar_select %p278_p2, %s955_s21, 1  ;;  %322 = vmatpush.msra.mxu2 %v304_v1  ;;  %v291_v7 = vld [vmem:[#allocation2 + $0x20] sm:$0xff]  ;;  %v290_v9 = vld [vmem:[#allocation2 + $0x18] sm:$0xff]  ;;  %v300_v10 = vld [vmem:[#allocation2 + $0x50] sm:$0xff] }
  0x27   : > { %s697_s30 = sshll.u32 %s277_s24, 2  ;;  %351 = vmatpush.msra.mxu1 %v293_v4  ;;  %v289_v11 = vld [vmem:[#allocation2 + $0x10] sm:$0xff]  ;;  %v299_v12 = vld [vmem:[#allocation2 + $0x48] sm:$0xff]  ;;  %v450_v13 = vld [vmem:[#allocation5 + $0x78] sm:$0xff]  ;;  %s706_s27 = sadd.s32 4294967295, %s705_s17 }
  0x28   : > { %s696_s29 = sshll.u32 %s279_s28, 1  ;;  %323 = vmatpush.msra.mxu2 %v303_v3  ;;  %v449_v14 = vld [vmem:[#allocation5 + $0x70] sm:$0xff]  ;;  %v288_v15 = vld [vmem:[#allocation2 + $0x8] sm:$0xff]  ;;  %495 = vmatpush.msra.mxu0 %v450_v13  ;;  %v298_v16 = vld [vmem:[#allocation2 + $0x40] sm:$0xff]  ;;  %s709_s9 = sshll.u32 %s959_s22, 1 }
  0x29   : > { %s282_s11 = sadd.s32 %s697_s30, %s696_s29  ;;  %352 = vmatpush.msra.mxu1 %v292_v5  ;;  %v448_v17 = vld [vmem:[#allocation5 + $0x68] sm:$0xff]  ;;  %v287_v19 = vld [vmem:[#allocation2] sm:$0xff]  ;;  %v375_v20 = vld [vmem:[#allocation2 + $0xb8] sm:$0xff]  ;;  %s273_s10 = sand.u32 1, %s947_s19  }
  0x2a   : > { %324 = vmatpush.msra.mxu2 %v302_v6  ;;  %s698_s12 = sshll.u32 %s282_s11, 3  ;;  %496 = vmatpush.msra.mxu0 %v449_v14  ;;  %v447_v22 = vld [vmem:[#allocation5 + $0x60] sm:$0xff]  ;;  %v374_v23 = vld [vmem:[#allocation2 + $0xb0] sm:$0xff]  ;;  %v373_v24 = vld [vmem:[#allocation2 + $0xa8] sm:$0xff]  ;;  %s576_s24 = sadd.s32 %s955_s21, %s709_s9 }
  0x2b   : > { %353 = vmatpush.msra.mxu1 %v291_v7  ;;  %s1113_s15 = scalar_lea.vmem %s1178_s0, %s698_s12  ;;  %v372_v25 = vld [vmem:[#allocation2 + $0xa0] sm:$0xff]  ;;  %v371_v27 = vld [vmem:[#allocation2 + $0x98] sm:$0xff]  ;;  %v370_v29 = vld [vmem:[#allocation2 + $0x90] sm:$0xff]  ;;  %s695_s28 = sshll.u32 %s273_s10, 3 }
  0x2c   : > { %325 = vmatpush.msra.mxu2 %v301_v8  ;;  %v295_v18 = vld [vmem:[%s1113_s15 + $0x1] sm:$0xff]  ;;  %497 = vmatpush.msra.mxu0 %v448_v17  ;;  %v296_v26 = vld [vmem:[%s1113_s15 + $0x9] sm:$0x3]  ;;  %v446_v34 = vld [vmem:[#allocation5 + $0x58] sm:$0xff]  ;;  %s710_s29 = sshll.u32 %s576_s24, 3  ;;  %s566_s21 = scalar_lea.sflag [#allocation4], %s273_s10 }
  0x2d   : > { %354 = vmatpush.msra.mxu1 %v290_v9  ;;  %v285_v21 = vld [vmem:[%s1113_s15] sm:$0xff]  ;;  %v286_v28 = vld [vmem:[%s1113_s15 + $0x8] sm:$0x3]  ;;  %v366_v33 = vld [vmem:[%s1113_s15 + $0xa] sm:$0x3]  ;;  %s578_s14 = scalar_lea.hbm %s1183_s5, %s710_s29  ;;  %s889_s24 = scalar_lea.hbm %s1183_s5, 32 }
  0x2e   : > { %326 = vmatpush.msra.mxu2 %v300_v10  ;;  %498 = vmatpush.msra.mxu0 %v447_v22  ;;  %v369_v30 = vld [vmem:[#allocation2 + $0x88] sm:$0xff]  ;;  %v368_v31 = vld [vmem:[#allocation2 + $0x80] sm:$0xff]  ;;  %v445_v35 = vld [vmem:[#allocation5 + $0x50] sm:$0xff]  ;;  %s582_s17 = sshll.u32 %s578_s14, 4  ;;  %s583_s17 = int_to_ptr.hbm [resolvable:$true] %s582_s17 }
  0x2f   : > { %355 = vmatpush.msra.mxu1 %v289_v11  ;;  %v365_v32 = vld [vmem:[%s1113_s15 + $0x2] sm:$0xff]  ;;  %v467_v36 = vld [vmem:[#allocation5 + $0xf8] sm:$0xff]  ;;  %v466_v39 = vld [vmem:[#allocation5 + $0xf0] sm:$0xff]  ;;  %s275_s15 = scalar_lea.vmem [#allocation7], %s695_s28 }
  0x30   : > { %327 = vmatpush.msra.mxu2 %v299_v12  ;;  %499 = vmatpush.msra.mxu0 %v446_v34  ;;  %v444_v37 = vld [vmem:[#allocation5 + $0x48] sm:$0xff]  ;;  %v531_v38 = vld [vmem:[#allocation5 + $0x178] sm:$0xff]  ;;  %v443_v40 = vld [vmem:[#allocation5 + $0x40] sm:$0xff]  ;;  %s580_s22 = sshll.u32 %s275_s15, 4  ;;  %s581_s22 = int_to_ptr.vmem [resolvable:$true] %s580_s22 }
  0x31   : > { %356 = vmatpush.msra.mxu1 %v288_v15  ;;  %475 = vmatpush.msra.mxu3 %v467_v36  ;;  %v530_v41 = vld [vmem:[#allocation5 + $0x170] sm:$0xff]  ;;  %v465_v42 = vld [vmem:[#allocation5 + $0xe8] sm:$0xff]  ;;  %v442_v43 = vld [vmem:[#allocation5 + $0x38] sm:$0xff]  ;;  %v417_v15 = vlaneseq }
  0x32   : > { %328 = vmatpush.msra.mxu2 %v298_v16  ;;  %500 = vmatpush.msra.mxu0 %v445_v35  ;;  %v529_v44 = vld [vmem:[#allocation5 + $0x168] sm:$0xff]  ;;  %v464_v45 = vld [vmem:[#allocation5 + $0xe0] sm:$0xff]  ;;  %v441_v46 = vld [vmem:[#allocation5 + $0x30] sm:$0xff] }
  0x33   : > { %699 = vmatmul.msk.f32.vlgmr.msra.gmra.mxu2 %vm306_vm0, %v295_v18  ;;  %357 = vmatpush.msra.mxu1 %v287_v19  ;;  %v528_v47 = vld [vmem:[#allocation5 + $0x160] sm:$0xff]  ;;  %v463_v48 = vld [vmem:[#allocation5 + $0xd8] sm:$0xff]  ;;  %v440_v49 = vld [vmem:[#allocation5 + $0x28] sm:$0xff]  ;;  %v418_v17 = vshrl.u32 %v417_v15, 7  ;;  %v420_v19 = vstv %s706_s27  ;;  %s883_s27 = sshra.s32 %s583_s17, 4  ;;  %s884_s27 = int_to_ptr.hbm [resolvable:$true] %s883_s27 }
  0x34   : > { %390 = vmatpush.msrb.mxu2 %v375_v20  ;;  %701 = vmatmul.msk.f32.vlgmr.msra.gmra.mxu1 %vm306_vm0, %v285_v21  ;;  %v527_v50 = vld [vmem:[#allocation5 + $0x158] sm:$0xff]  ;;  %v462_v51 = vld [vmem:[#allocation5 + $0xd0] sm:$0xff]  ;;  %v439_v52 = vld [vmem:[#allocation5 + $0x20] sm:$0xff]  ;;  %s885_s6 = scalar_lea.hbm %s884_s27, 8  ;;  %p890_p7 = scmp.lt.s32.totalorder %s884_s27, %s1183_s5 }
  0x35   : > { %537 = vmatpush.msrb.mxu1 %v531_v38  ;;  %501 = vmatpush.msra.mxu0 %v444_v37  ;;  %v526_v53 = vld [vmem:[#allocation5 + $0x150] sm:$0xff]  ;;  %v461_v54 = vld [vmem:[#allocation5 + $0xc8] sm:$0xff]  ;;  %v438_v55 = vld [vmem:[#allocation5 + $0x18] sm:$0xff]  ;;  %v421_v20 = vadd.s32 %v420_v19, %v418_v17  ;;  %p886_p4 = scmp.ne.s32.totalorder %s884_s27, %s885_s6  ;;  %p891_p9 = scmp.lt.s32.totalorder %s889_s24, %s885_s6 }
  0x36   : > { %391 = vmatpush.msrb.mxu2 %v374_v23  ;;  %476 = vmatpush.msra.mxu3 %v466_v39  ;;  %v525_v56 = vld [vmem:[#allocation5 + $0x148] sm:$0xff]  ;;  %v460_v57 = vld [vmem:[#allocation5 + $0xc0] sm:$0xff]  ;;  %v437_v58 = vld [vmem:[#allocation5 + $0x10] sm:$0xff] }
  0x37   : > { %538 = vmatpush.msrb.mxu1 %v530_v41  ;;  %502 = vmatpush.msra.mxu0 %v443_v40  ;;  %v524_v59 = vld [vmem:[#allocation5 + $0x140] sm:$0xff]  ;;  %v459_v60 = vld [vmem:[#allocation5 + $0xb8] sm:$0xff]  ;;  %v436_v61 = vld [vmem:[#allocation5 + $0x8] sm:$0xff]  ;;  %vm423_vm1 = vcmp.ge.s32.totalorder %v421_v20, 0  ;;  %vm425_vm2 = vcmp.lt.s32.totalorder %v421_v20, 16  ;;  %p887_p5 = pnand %p886_p4, %p1059_p3  ;;  %p892_p10 = por %p891_p9, %p890_p7 }
  0x38   : > { %392 = vmatpush.msrb.mxu2 %v373_v24  ;;  %477 = vmatpush.msra.mxu3 %v465_v42  ;;  %v523_v62 = vld [vmem:[#allocation5 + $0x138] sm:$0xff]  ;;  %v458_v63 = vld [vmem:[#allocation5 + $0xb0] sm:$0xff]  ;;  %v435_v0 = vld [vmem:[#allocation5] sm:$0xff] }
  0x39   : > { %503 = vmatpush.msra.mxu0 %v442_v43  ;;  %539 = vmatpush.msrb.mxu1 %v529_v44  ;;  %v522_v1 = vld [vmem:[#allocation5 + $0x130] sm:$0xff]  ;;  %v457_v2 = vld [vmem:[#allocation5 + $0xa8] sm:$0xff]  ;;  %v456_v4 = vld [vmem:[#allocation5 + $0xa0] sm:$0xff]  ;;  %p888_p6 = pneg %p887_p5 }
  0x3a   : > { %393 = vmatpush.msrb.mxu2 %v372_v25  ;;  %478 = vmatpush.msra.mxu3 %v464_v45  ;;  %v521_v3 = vld [vmem:[#allocation5 + $0x128] sm:$0xff]  ;;  %v520_v5 = vld [vmem:[#allocation5 + $0x120] sm:$0xff]  ;;  %v455_v6 = vld [vmem:[#allocation5 + $0x98] sm:$0xff]  ;;  %v419_v25 = vadd.s32 8, %v418_v17 }
  0x3b   : > { %700 = vmatmul.msk.f32.gmra.mxu2 %vm306_vm0, %v296_v26  ;;  %504 = vmatpush.msra.mxu0 %v441_v46  ;;  %v519_v7 = vld [vmem:[#allocation5 + $0x118] sm:$0xff]  ;;  %v454_v8 = vld [vmem:[#allocation5 + $0x90] sm:$0xff]  ;;  %v453_v10 = vld [vmem:[#allocation5 + $0x88] sm:$0xff]  ;;  %p893_p11 = pnand %p892_p10, %p888_p6 }
  0x3c   : > { %394 = vmatpush.msrb.mxu2 %v371_v27  ;;  %702 = vmatmul.msk.f32.gmra.mxu1 %vm306_vm0, %v286_v28  ;;  %v518_v9 = vld [vmem:[#allocation5 + $0x110] sm:$0xff]  ;;  %v517_v11 = vld [vmem:[#allocation5 + $0x108] sm:$0xff]  ;;  %v452_v13 = vld [vmem:[#allocation5 + $0x80] sm:$0xff] }
  0x3d   : > { %540 = vmatpush.msrb.mxu1 %v528_v47  ;;  %479 = vmatpush.msra.mxu3 %v463_v48  ;;  %v516_v14 = vld [vmem:[#allocation5 + $0x100] sm:$0xff]  ;;  %vm427_vm3 = vmand %vm423_vm1, %vm425_vm2 }
  0x3e   : > { %395 = vmatpush.msrb.mxu2 %v370_v29  ;;  %505 = vmatpush.msra.mxu0 %v440_v49  ;;  %v807_v22 = vld [vmem:[%s1180_s2] ss:$0 sm:$0xff]  ;;  %v422_v29 = vadd.s32 %v420_v19, %v419_v25 }
  0x3f   : > { %541 = vmatpush.msrb.mxu1 %v527_v50  ;;  %480 = vmatpush.msra.mxu3 %v462_v51  ;;  %v808_v46 = vld [vmem:[%s1182_s4] ss:$0 sm:$0xff] }
  0x40   : > { %396 = vmatpush.msrb.mxu2 %v369_v30  ;;  %506 = vmatpush.msra.mxu0 %v439_v52  ;;  %vm424_vm4 = vcmp.ge.s32.totalorder %v422_v29, 0  ;;  %vm426_vm5 = vcmp.lt.s32.totalorder %v422_v29, 16 }
  0x41   : > { %542 = vmatpush.msrb.mxu1 %v526_v53  ;;  %481 = vmatpush.msra.mxu3 %v461_v54  ;;  %vm428_vm6 = vmand %vm424_vm4, %vm426_vm5 }
  0x42   : > { %397 = vmatpush.msrb.mxu2 %v368_v31  ;;  %507 = vmatpush.msra.mxu0 %v438_v55 }
  0x43   : > { %703 = vmatmul.msk.f32.vlgmr.msrb.gmra.mxu2 %vm306_vm0, %v365_v32  ;;  %543 = vmatpush.msrb.mxu1 %v525_v56 }
  0x44   : > { %482 = vmatpush.msra.mxu3 %v460_v57  ;;  %508 = vmatpush.msra.mxu0 %v437_v58 }
  0x45   : > { %544 = vmatpush.msrb.mxu1 %v524_v59 }
  0x46   : > { %483 = vmatpush.msra.mxu3 %v459_v60  ;;  %509 = vmatpush.msra.mxu0 %v436_v61 }
  0x47   : > { %545 = vmatpush.msrb.mxu1 %v523_v62 }
  0x48   : > { %484 = vmatpush.msra.mxu3 %v458_v63  ;;  %510 = vmatpush.msra.mxu0 %v435_v0 }
  0x49   : > { %546 = vmatpush.msrb.mxu1 %v522_v1 }
  0x4a   : > { %485 = vmatpush.msra.mxu3 %v457_v2 }
  0x4b   : > { %704 = vmatmul.msk.f32.gmra.mxu2 %vm306_vm0, %v366_v33  ;;  %547 = vmatpush.msrb.mxu1 %v521_v3 }
  0x4c   : > { %486 = vmatpush.msra.mxu3 %v456_v4 }
  0x4d   : > { %548 = vmatpush.msrb.mxu1 %v520_v5 }
  0x4e   : > { %487 = vmatpush.msra.mxu3 %v455_v6 }
  0x4f   : > { %549 = vmatpush.msrb.mxu1 %v519_v7 }
  0x50   : > { %488 = vmatpush.msra.mxu3 %v454_v8 }
  0x51   : > { %550 = vmatpush.msrb.mxu1 %v518_v9 }
  0x52   : > { %489 = vmatpush.msra.mxu3 %v453_v10 }
  0x53   : > { %551 = vmatpush.msrb.mxu1 %v517_v11 }
  0x54   : > { %490 = vmatpush.msra.mxu3 %v452_v13 }
  0x55   : > { %552 = vmatpush.msrb.mxu1 %v516_v14 }
  0xb1   : > { %v359_v18 = vpop.f32.mrf.mxu1 }
  0xb6   : > { %v330_v12 = vpop.f32.mrf.mxu2 }
  0xb7   : > { %v360_v21 = vadd.f32 %v359_v18, %v330_v12 }
  0xb9   : > { %v362_v27 = vpop.f32.mrf.mxu1 }
  0xbe   : > { %v333_v16 = vpop.f32.mrf.mxu2 }
  0xbf   : > { %v363_v30 = vadd.f32 %v362_v27, %v333_v16 }
  0xc6   : > { %v399_v23 = vpop.f32.mrf.mxu2 }
  0xc7   : > { %v405_v24 = vadd.f32 %v399_v23, %v360_v21 }
  0xc9   : > { %v411_v26 = vadd.f32 %v807_v22, %v405_v24 }
  0xcb   : > { %v413_v28 = vmax.f32 %v411_v26, 0.0 }
  0xcd   : > { %707 = vmatmul.msk.f32.vlgmr.msra.gmra.mxu0 %vm427_vm3, %v413_v28  ;;  %v433_v34 = vsel %vm427_vm3, %v413_v28, 0.0 }
  0xce   : > { %v402_v31 = vpop.f32.mrf.mxu2  ;;  %v471_v37 = vrot.slane %v433_v34, 1  ;;  %v533_v38 = vrot.slane %v433_v34, 2 }
  0xcf   : > { %v406_v32 = vadd.f32 %v402_v31, %v363_v30 }
  0xd1   : > { %v412_v33 = vadd.f32 %v807_v22, %v406_v32 }
  0xd3   : > { %v414_v35 = vmax.f32 %v412_v33, 0.0 }
  0xd5   : > { %v434_v36 = vsel %vm428_vm6, %v414_v35, 0.0 }
  0xd6   : > { %v534_v39 = vrot.slane %v434_v36, 2  ;;  %v472_v40 = vrot.slane %v434_v36, 1 }
  0xd8   : > { %v473_v41 = vsel %vm470_vm7, %v471_v37, %v472_v40  ;;  %v535_v42 = vsel %vm532_vm8, %v533_v38, %v534_v39 }
  0xd9   : > { %491 = vmatmul.f32.vlgmr.msra.gmra.mxu3 %v473_v41  ;;  %553 = vmatmul.f32.vlgmr.msrb.gmra.mxu1 %v535_v42 }
 0x14a   : > { %v512_v43 = vpop.f32.mrf.mxu0 }
 0x156   : > { %v554_v47 = vpop.f32.mrf.mxu1 }
 0x15c   : > { %v492_v44 = vpop.f32.mrf.mxu3 }
 0x15d   : > { %v513_v45 = vadd.f32 %v512_v43, %v492_v44 }
 0x15f   : > { %v557_v48 = vadd.f32 %v554_v47, %v513_v45 }
 0x161   : > { %v562_v49 = vadd.f32 %v808_v46, %v557_v48 }
 0x163   : > { %v563_v50 = vmax.f32 %v562_v49, 0.0 }
 0x165   : > { %564 = vst [vmem:[%s275_s15] sm:$0xff] %v563_v50 }
 0x166   : > { %896 = shalt.err (!%p893_p11)
}
 0x167   : > { %721 = dma.vmem_to_hbm [thread:$0]  (%p1059_p3), %s581_s22, 128, %s583_s17, %s566_s21  }
 0x168 PF: > { %p738_p12 = scmp.ge.s32.totalorder %s971_s25, 2  ;;  %s594_s10 = sand.u32 1, %s943_s18  }
 0x169   : > { %s595_s30 = scalar_lea.sflag [#allocation4], %s594_s10 }
 0x16a   : > { %p731_p13 = pnand %p738_p12, %p1068_p8 }
 0x16c   : > { %p732_p0 = pneg %p731_p13 }
 0x16e   : > { %938 = dma.done.wait (%p732_p0), %s595_s30, 128  }
 0x16f   : > { %940 = vsyncadd (%p732_p0), %s595_s30, 4294967168  ;;  %s20_s25 = sadd.s32 1, %s971_s25   ;;  %s1194_s22 = sld [smem:[#allocation11_spill]] }
 0x170   : > { %p17_p1 = scmp.ge.s32.totalorder %s20_s25, 6   ;;  %s1195_s7 = sld [smem:[#allocation12_spill]] }
 0x171   : > { %s1196_s24 = sld [smem:[#allocation13_spill]]  ;;  %s1197_s18 = smov %s947_s19 }
 0x172   : > { %s1198_s19 = smov %s951_s20  ;;  %s1199_s20 = smov %s1089_s16 }
 0x173   : > { %s1200_s21 = smov %s963_s23  ;;  %19 = sbr.rel (!%p17_p1) target bundleno = 7 (0x7), region = 88 }
 0x176   : > { %s1201_s23 = smov %s1195_s7 }
 0x178   :  { %601 = vsyncpa [#allocation3], 1 }
 0x179   :  { %603 = vsyncpa [#allocation3 + $0x1], 1 }
 0x17a   :  { %604 = vsyncpa [#allocation6], 1 }
 0x17b   :  { %605 = vsyncpa [#allocation4], 1 }
 0x17c   :  { %607 = vsyncpa [#allocation4 + $0x1], 1 }

</bundles_post_ra>
